<compile_context>
chip_gen: v7x
topology: tpu7x:2x2x1
jax: 0.10.0
libtpu: 0.0.40
codegen_flags: <defaults>
</compile_context>

<pallas_src>
import functools

import jax
import jax.numpy as jnp
from jax import lax
from jax.experimental import pallas as pl
from jax.experimental.pallas import tpu as pltpu


def _fused_ngram_cnn_kernel(x_ref, w_ref, p_ref, o_ref, *, m_pad):
    """One flattened MXU matmul + fused epilogue for all kernel sizes.

    x_ref: (Bt*M_pad, Kc)  bf16 im2col'ed activations; column kmax*E is a ones
                           column that folds the conv bias into the matmul.
    w_ref: (Kc, Cpad)      bf16 stacked conv weights + bias row (zeros elsewhere).
    p_ref: (P_rows, Cpad)  f32; rows [0, M_pad) = BN shift + additive branch /
                           time-window mask (0 or -inf); row M_pad = BN scale.
    o_ref: (Bt, Cpad)      f32 pooled output (lane-dense, 128-wide).
    """
    bt_m, _ = x_ref.shape
    cpad = o_ref.shape[-1]
    bt = bt_m // m_pad

    # Conv over ALL branches and taps (+ bias) as a single
    # (Bt*M_pad, Kc) x (Kc, Cpad) MXU matmul with f32 accumulation.
    acc = jnp.dot(x_ref[...], w_ref[...], preferred_element_type=jnp.float32)
    acc = jnp.maximum(acc, 0.0)                                   # ReLU

    # Eval BatchNorm1d: scale, then (shift + -inf window mask) in one add.
    scale = p_ref[pl.ds(m_pad, 1), :]                             # (1, Cpad)
    shift_mask = p_ref[pl.ds(0, m_pad), :]                        # (M_pad, Cpad)
    # M_pad is a multiple of 8 -> this reshape is sublane-tile aligned (free).
    acc = acc.reshape(bt, m_pad, cpad) * scale[None] + shift_mask[None]

    o_ref[...] = jnp.max(acc, axis=1).astype(o_ref.dtype)         # max over time


def _pick_batch_tile(B, M_pad, Kc, Cpad):
    """Largest batch tile under a conservative VMEM / vreg-pressure budget.

    Budget is derived from v7x (64 MiB physical / 32 MiB default scoped VMEM
    per TensorCore) so the same tile also fits v5e/v6e.  Keeps >= 2 grid steps
    when possible so the "parallel" batch axis can use both v7x TCs / megacore.
    """
    if B % 8 != 0:
        return B
    cands = [d for d in range(8, B + 1, 8) if B % d == 0]

    def fits(d):
        vmem = (2 * d * M_pad * Kc * 2          # double-buffered bf16 input blocks
                + 2 * d * Cpad * 4              # double-buffered f32 output blocks
                + 2 * Kc * Cpad * 2             # stacked weights (grid-invariant)
                + 2 * (M_pad + 8) * Cpad * 4)   # merged scale/shift/mask operand
        # d*M_pad <= 256 keeps the f32 matmul result <= 128 KiB (half the vreg
        # file) so the fused epilogue does not spill.
        return vmem <= (24 << 20) and d * M_pad <= 256

    ok = [d for d in cands if fits(d)] or [8]
    multi = [d for d in ok if B // d >= 2]
    return max(multi) if multi else max(ok)


def ngram_module_forward(token_ids, params):
    """NgramModule.forward (cnn path), inference mode."""
    kernel_sizes = params['kernel_sizes']
    emb_table = params['embeddings']
    B, S = token_ids.shape
    E = emb_table.shape[1]
    C = params['conv_layers'][0]['w'].shape[2]
    nK = len(kernel_sizes)
    kmax = max(kernel_sizes)
    pad_left = kmax // 2

    # Per-branch conv output length and its [lo, hi) window inside the shared
    # zero-padded sequence (shared left pad = kmax//2 zeros).
    lengths = [S + 2 * (K // 2) - K + 1 for K in kernel_sizes]
    assert all(n >= 1 for n in lengths), "sequence shorter than a conv kernel"
    col_lo = [pad_left - K // 2 for K in kernel_sizes]
    col_hi = [lo + n for lo, n in zip(col_lo, lengths)]
    M = max(col_hi)                                   # shared conv positions
    M_pad = ((M + 7) // 8) * 8                        # sublane-aligned time axis
    S_shared = M + kmax - 1
    pad_right = S_shared - S - pad_left

    Cout = nK * C
    Cpad = ((Cout + 127) // 128) * 128                # lane-dense output width
    Kc = ((kmax * E + 1 + 127) // 128) * 128          # contraction: taps*E + bias col
    P_rows = M_pad + 8                                # merged epilogue operand rows

    # --- EmbeddingsModule.forward + ONE shared zero-pad + im2col (XLA glue) ---
    # TODO(synk): fuse gather + pad + im2col into the kernel with scalar-
    # prefetched token ids and a manual DMA gather (removes the HBM round-trip;
    # biggest win on v5e).  Kept as wrapper glue here.
    emb = jnp.take(emb_table, token_ids, axis=0)                        # (B,S,E) f32
    xpad = jnp.pad(emb, ((0, 0), (pad_left, pad_right), (0, 0)))        # (B,S_shared,E)
    idx = jnp.arange(M)[:, None] + jnp.arange(kmax)[None, :]            # (M, kmax)
    xi = xpad[:, idx, :].reshape(B, M, kmax * E)                        # tap-major im2col
    xi = jnp.concatenate([xi, jnp.ones((B, M, 1), xi.dtype)], axis=-1)  # bias ones col
    xi = jnp.pad(xi, ((0, 0), (0, M_pad - M), (0, Kc - (kmax * E + 1))))
    x2d = xi.reshape(B * M_pad, Kc).astype(jnp.bfloat16)

    # --- Stacked weights: branch i owns output columns [i*C, (i+1)*C); row
    # k*E + e is tap k / emb-dim e; row kmax*E is the conv bias (folded in via
    # the ones column); unused taps / padding columns stay zero. ---------------
    w_flat = jnp.zeros((Kc, Cpad), jnp.float32)
    scale_full = jnp.zeros((Cpad,), jnp.float32)
    shift_full = jnp.zeros((Cpad,), jnp.float32)
    mask = jnp.full((M_pad, Cpad), -jnp.inf, jnp.float32)
    for i, (K, p) in enumerate(zip(kernel_sizes, params['conv_layers'])):
        cs = i * C
        w_flat = w_flat.at[:K * E, cs:cs + C].set(p['w'].reshape(K * E, C))
        w_flat = w_flat.at[kmax * E, cs:cs + C].set(p['b'])
        scale_full = scale_full.at[cs:cs + C].set(p['scale'])
        shift_full = shift_full.at[cs:cs + C].set(p['shift'])
        mask = mask.at[col_lo[i]:col_hi[i], cs:cs + C].set(0.0)
    w_flat = w_flat.astype(jnp.bfloat16)

    # Merged epilogue operand: rows [0, M_pad) = BN shift + additive window
    # mask; row M_pad = BN scale; remaining rows pad to a multiple of 8.
    p_merged = jnp.zeros((P_rows, Cpad), jnp.float32)
    p_merged = p_merged.at[:M_pad, :].set(mask + shift_full[None, :])
    p_merged = p_merged.at[M_pad, :].set(scale_full)

    Bt = _pick_batch_tile(B, M_pad, Kc, Cpad)
    grid = (pl.cdiv(B, Bt),)

    # Useful conv MACs only (no structurally-zero taps / padding columns).
    flops = int(sum(2 * B * L * K * E * C for K, L in zip(kernel_sizes, lengths)))
    bytes_accessed = int(B * M_pad * Kc * 2 + Kc * Cpad * 2
                         + P_rows * Cpad * 4 + B * Cpad * 4)

    out = pl.pallas_call(
        functools.partial(_fused_ngram_cnn_kernel, m_pad=M_pad),
        out_shape=jax.ShapeDtypeStruct((B, Cpad), jnp.float32),
        grid=grid,
        in_specs=[
            pl.BlockSpec((Bt * M_pad, Kc), lambda i: (i, 0)),
            pl.BlockSpec((Kc, Cpad), lambda i: (0, 0)),
            pl.BlockSpec((P_rows, Cpad), lambda i: (0, 0)),
        ],
        out_specs=pl.BlockSpec((Bt, Cpad), lambda i: (i, 0)),
        compiler_params=pltpu.CompilerParams(
            dimension_semantics=("parallel",),
            vmem_limit_bytes=32 * 1024 * 1024),
        cost_estimate=pl.CostEstimate(flops=flops, transcendentals=0,
                                      bytes_accessed=bytes_accessed),
    )(x2d, w_flat, p_merged)

    # Drop the 96->128 lane padding; column order matches torch.cat over branches.
    return out[:, :Cout]


def _reference_forward(token_ids, params):
    """Pure-JAX f32 reference using lax.conv_general_dilated (NCW, like PyTorch)."""
    emb = jnp.take(params['embeddings'], token_ids, axis=0)   # (B, S, E)
    x = jnp.transpose(emb, (0, 2, 1))                         # (B, E, S) == NCW
    outs = []
    for K, p in zip(params['kernel_sizes'], params['conv_layers']):
        w_oik = jnp.transpose(p['w'], (2, 1, 0))              # (C, E, K)
        y = lax.conv_general_dilated(
            x, w_oik, window_strides=(1,), padding=[(K // 2, K // 2)],
            dimension_numbers=('NCH', 'OIH', 'NCH'))
        y = y + p['b'][None, :, None]
        y = jnp.maximum(y, 0.0)
        y = y * p['scale'][None, :, None] + p['shift'][None, :, None]
        outs.append(jnp.max(y, axis=2))
    return jnp.concatenate(outs, axis=1)


def _init_params(key, vocab, emb_dims, channels_out, kernel_sizes):
    keys = jax.random.split(key, 1 + 6 * len(kernel_sizes))
    embeddings = 0.1 * jax.random.normal(keys[0], (vocab, emb_dims), jnp.float32)
    eps = 1e-5
    conv_layers = []
    for i, K in enumerate(kernel_sizes):
        k0, k1, k2, k3, k4, k5 = keys[1 + 6 * i: 7 + 6 * i]
        w = 0.1 * jax.random.normal(k0, (K, emb_dims, channels_out), jnp.float32)
        b = 0.01 * jax.random.normal(k1, (channels_out,), jnp.float32)
        # Non-trivial eval-mode BatchNorm1d statistics, folded to scale/shift.
        gamma = 1.0 + 0.1 * jax.random.normal(k2, (channels_out,), jnp.float32)
        beta = 0.1 * jax.random.normal(k3, (channels_out,), jnp.float32)
        r_mean = 0.05 * jax.random.normal(k4, (channels_out,), jnp.float32)
        r_var = 0.5 + jnp.abs(jax.random.normal(k5, (channels_out,), jnp.float32))
        scale = gamma / jnp.sqrt(r_var + eps)
        shift = beta - r_mean * scale
        conv_layers.append(dict(w=w, b=b, scale=scale, shift=shift))
    return dict(embeddings=embeddings, kernel_sizes=tuple(kernel_sizes),
                conv_layers=conv_layers)


if __name__ == "__main__":
    # Small, forward-consistent shapes (2 batch tiles on the 'parallel' grid).
    B, S = 16, 8            # batch of ngram (token id) sequences
    vocab, E = 50, 32       # embedding table
    C = 32                  # LayerCNN channels_out per kernel size
    kernel_sizes = [3, 4, 5]

    key = jax.random.PRNGKey(0)
    k_param, k_ids = jax.random.split(key)
    params = _init_params(k_param, vocab, E, C, kernel_sizes)
    token_ids = jax.random.randint(k_ids, (B, S), 0, vocab, dtype=jnp.int32)

    out = jax.block_until_ready(ngram_module_forward(token_ids, params))
    ref = jax.block_until_ready(_reference_forward(token_ids, params))

    assert out.shape == (B, len(kernel_sizes) * C), out.shape
    max_err = float(jnp.max(jnp.abs(out - ref)))
    # bf16 MXU inputs (and folded bf16 bias) with f32 accumulation ->
    # looser tolerance than pure f32.
    assert jnp.allclose(out, ref, rtol=2e-2, atol=2e-2), max_err
    print("KERNEL_OK")
</pallas_src>

<mosaic_0001>
module attributes {stable_mosaic.version = 11 : i64} {
  func.func @_fused_ngram_cnn_kernel(%arg0: i32, %arg1: memref<128x256xbf16, #tpu.memory_space<vmem>>, %arg2: memref<256x128xbf16, #tpu.memory_space<vmem>>, %arg3: memref<24x128xf32, #tpu.memory_space<vmem>>, %arg4: memref<8x128xf32, #tpu.memory_space<vmem>>) attributes {dimension_semantics = [#tpu.dimension_semantics<parallel>], iteration_bounds = array<i64: 2>, scalar_prefetch = 0 : i64, scratch_operands = 0 : i64, tpu.core_type = #tpu.core_type<tc>, window_params = [{transform_indices = @transform_0, window_bounds = array<i64: 128, 256>}, {pipeline_mode = #tpu.pipeline_mode<synchronous>, transform_indices = @transform_1, window_bounds = array<i64: 256, 128>}, {pipeline_mode = #tpu.pipeline_mode<synchronous>, transform_indices = @transform_2, window_bounds = array<i64: 24, 128>}, {transform_indices = @transform_3, window_bounds = array<i64: 8, 128>}]} {
    %c0 = arith.constant 0 : index
    %c0_0 = arith.constant 0 : index
    %0 = vector.load %arg1[%c0, %c0_0] : memref<128x256xbf16, #tpu.memory_space<vmem>>, vector<128x256xbf16>
    %c0_1 = arith.constant 0 : index
    %c0_2 = arith.constant 0 : index
    %1 = vector.load %arg2[%c0_1, %c0_2] : memref<256x128xbf16, #tpu.memory_space<vmem>>, vector<256x128xbf16>
    %cst = arith.constant dense<0.000000e+00> : vector<128x128xf32>
    %2 = tpu.matmul %0, %1, %cst {dimension_numbers = #tpu.dot_dimension_numbers<[1], [0], [0], [1], [0, 0, 1, 1], [], []>} : vector<128x256xbf16>, vector<256x128xbf16>, vector<128x128xf32> -> vector<128x128xf32>
    %cst_3 = arith.constant 0.000000e+00 : f32
    %3 = vector.broadcast %cst_3 : f32 to vector<128x128xf32>
    %4 = arith.maximumf %2, %3 : vector<128x128xf32>
    %c16 = arith.constant 16 : index
    %c0_4 = arith.constant 0 : index
    %5 = vector.load %arg3[%c16, %c0_4] : memref<24x128xf32, #tpu.memory_space<vmem>>, vector<1x128xf32>
    %c0_5 = arith.constant 0 : index
    %c0_6 = arith.constant 0 : index
    %6 = vector.load %arg3[%c0_5, %c0_6] : memref<24x128xf32, #tpu.memory_space<vmem>>, vector<16x128xf32>
    %7 = vector.shape_cast %4 : vector<128x128xf32> to vector<8x16x128xf32>
    %8 = vector.shape_cast %5 : vector<1x128xf32> to vector<1x1x128xf32>
    %9 = vector.broadcast %8 : vector<1x1x128xf32> to vector<8x16x128xf32>
    %10 = arith.mulf %7, %9 : vector<8x16x128xf32>
    %11 = vector.shape_cast %6 : vector<16x128xf32> to vector<1x16x128xf32>
    %12 = vector.broadcast %11 : vector<1x16x128xf32> to vector<8x16x128xf32>
    %13 = arith.addf %10, %12 : vector<8x16x128xf32>
    %cst_7 = arith.constant dense<0xFF800000> : vector<8x128xf32>
    %14 = vector.multi_reduction <maximumf>, %13, %cst_7 [1] : vector<8x16x128xf32> to vector<8x128xf32>
    %c0_8 = arith.constant 0 : index
    %c0_9 = arith.constant 0 : index
    %15 = vector.load %arg4[%c0_8, %c0_9] : memref<8x128xf32, #tpu.memory_space<vmem>>, vector<8x128xf32>
    tpu.vector_store %arg4[%c0_8, %c0_9], %14 {strides = array<i32>} : memref<8x128xf32, #tpu.memory_space<vmem>>, vector<8x128xf32>,
    return
  }
  func.func @transform_0(%arg0: i32) -> (i32, i32) {
    %c0_i32 = arith.constant 0 : i32
    %c0_i32_0 = arith.constant 0 : i32
    return %arg0, %c0_i32 : i32, i32
  }
  func.func @transform_1(%arg0: i32) -> (i32, i32) {
    %c0_i32 = arith.constant 0 : i32
    %c0_i32_0 = arith.constant 0 : i32
    %c0_i32_1 = arith.constant 0 : i32
    return %c0_i32, %c0_i32_0 : i32, i32
  }
  func.func @transform_2(%arg0: i32) -> (i32, i32) {
    %c0_i32 = arith.constant 0 : i32
    %c0_i32_0 = arith.constant 0 : i32
    %c0_i32_1 = arith.constant 0 : i32
    return %c0_i32, %c0_i32_0 : i32, i32
  }
  func.func @transform_3(%arg0: i32) -> (i32, i32) {
    %c0_i32 = arith.constant 0 : i32
    %c0_i32_0 = arith.constant 0 : i32
    return %arg0, %c0_i32 : i32, i32
  }
}

</mosaic_0001>

<bundles_post_ra>
// kernel: tpu_custom_call.1
= control target key start
LH: loop header
LB: loop body
LE: loop exit
PB: predicated region body
PF: predicated region fallthrough
CT: control target
= control target key end

     0   :  { %8 = vsyncpa [#allocation3], 0  ;;  %s1509_s0 = inlined_call_operand.hbm [shape: bf16[256,256], index: 0, kind: input, shape index: {}]   ;;  %s1510_s1 = inlined_call_operand.hbm [shape: bf16[256,128], index: 1, kind: input, shape index: {}]   ;;  %s1511_s2 = inlined_call_operand.hbm [shape: f32[24,128], index: 2, kind: input, shape index: {}]   ;;  %s1512_s3 = inlined_call_operand.hbm [shape: f32[16,128], index: 3, kind: output, shape index: {}]  }
   0x1   :  { %10 = vsyncpa [#allocation3 + $0x1], 0 }
   0x2   :  { %11 = vsyncpa [#allocation6], 0 }
   0x3   :  { %12 = vsyncpa [#allocation4], 0 }
   0x4   :  { %14 = vsyncpa [#allocation4 + $0x1], 0  ;;  %s1210_s12 = smov 0   ;;  %s1212_s13 = smov 0  }
   0x5   :  { %s1214_s14 = smov 0   ;;  %s1216_s15 = smov 0  }
   0x6 LB: > { %s1231_s16 = sadd.s32 4294967295, %s1180_s15   ;;  %s780_s17 = sadd.s32 4294967294, %s1180_s15   ;;  %s1180_s15 = sphi %s1216_s15, %s1532_s15   ;;  %s1176_s14 = sphi %s1214_s14, %s1531_s14   ;;  %s1172_s13 = sphi %s1212_s13, %s1530_s13   ;;  %s1168_s12 = sphi %s1210_s12, %s1529_s12  }
   0x7   : > { %p40_p0 = scmp.ne.s32.totalorder %s1172_s13, %s1168_s12  ;;  %p1513_p1 = scmp.eq.s32.totalorder %s1231_s16, 0 }
   0x8   : > { %p112_p3 = scmp.eq.s32.totalorder %s780_s17, 1  ;;  %p781_p5 = scmp.ge.s32.totalorder %s1180_s15, 1 }
   0x9   : > { %p1240_p4 = por %p1513_p1, %p40_p0  ;;  %p119_p7 = scmp.lt.s32.totalorder %s1180_s15, 3 }
   0xa   : > { %p1245_p6 = por %p112_p3, %p40_p0  ;;  %s1182_s21 = smov [#allocation5]  }
   0xb   : > { %s1516_s18 = scalar_select %p1240_p4, 1, 0 }
   0xc   : > { %s1517_s19 = scalar_select %p1245_p6, 1, 0 }
   0xd   : > { %p1250_p8 = pnand %p781_p5, %p119_p7  ;;  %s131_s22 = sshll.u32 %s1182_s21, 4  ;;  %s1254_s22 = int_to_ptr.vmem [resolvable:$true] %s131_s22 }
   0xe   : > { %s1183_s24 = smov [#allocation7]   ;;  %s1024_s28 = scalar_lea.hbm %s1510_s1, 2048 }
   0xf   : > { %p925_p9 = pneg %p1250_p8  ;;  %s144_s25 = sshll.u32 %s1183_s24, 4  ;;  %s1265_s25 = int_to_ptr.vmem [resolvable:$true] %s144_s25 }
  0x10   : > { %p1025_p12 = scmp.ne.s32.totalorder %s1510_s1, %s1024_s28  ;;  %p1031_p5 = scmp.lt.u32.totalorder %s1024_s28, %s1510_s1 }
  0x11   : > { %p1261_p11 = pnand %p925_p9, %p1513_p1 }
  0x13   : > { %p1026_p13 = pneg %p1261_p11 }
  0x15   : > { %p1027_p0 = pnand %p1026_p13, %p1025_p12 }
  0x17   : > { %p1028_p3 = pneg %p1027_p0 }
  0x19   : > { %p1033_p7 = pnand %p1031_p5, %p1028_p3 }
  0x1b   : > { %1036 = shalt.err (!%p1033_p7)
}
  0x1c   : > { %s1037_s6 = scalar_lea.vmem %s1254_s22, 2048  ;;  %p1045_p2 = scmp.lt.s32.totalorder %s1254_s22, %s1254_s22 }
  0x1d   : > { %p1038_p9 = scmp.ne.s32.totalorder %s1254_s22, %s1037_s6  ;;  %p1046_p12 = scmp.lt.s32.totalorder %s1037_s6, %s1037_s6 }
  0x1f   : > { %p1040_p10 = pnand %p1038_p9, %p1026_p13  ;;  %p1047_p0 = por %p1046_p12, %p1045_p2 }
  0x21   : > { %p1041_p1 = pneg %p1040_p10 }
  0x23   : > { %p1048_p6 = pnand %p1047_p0, %p1041_p1 }
  0x25   : > { %1051 = shalt.err (!%p1048_p6)
}
  0x26   : > { %s1184_s7 = smov 64   ;;  %s1185_s8 = smov 4  }
  0x27   : > { %928 = dma.hbm_to_vmem [thread:$0]  (!%p1261_p11), %s1510_s1, 2048, %s1254_s22, [#allocation6], %s1184_s7, %s1184_s7, %s1185_s8  }
  0x28   : > { %s1052_s21 = scalar_lea.hbm %s1511_s2, 384 }
  0x29   : > { %p1053_p2 = scmp.ne.s32.totalorder %s1511_s2, %s1052_s21  ;;  %p1059_p10 = scmp.lt.u32.totalorder %s1052_s21, %s1511_s2 }
  0x2b   : > { %p1055_p1 = pnand %p1053_p2, %p1026_p13 }
  0x2d   : > { %p1056_p6 = pneg %p1055_p1 }
  0x2f   : > { %p1061_p3 = pnand %p1059_p10, %p1056_p6 }
  0x31   : > { %1064 = shalt.err (!%p1061_p3)
}
  0x32   : > { %s1065_s22 = scalar_lea.vmem %s1265_s25, 384  ;;  %p1073_p12 = scmp.lt.s32.totalorder %s1265_s25, %s1265_s25 }
  0x33   : > { %p1066_p5 = scmp.ne.s32.totalorder %s1265_s25, %s1065_s22  ;;  %p1074_p0 = scmp.lt.s32.totalorder %s1065_s22, %s1065_s22 }
  0x35   : > { %p1068_p7 = pnand %p1066_p5, %p1026_p13  ;;  %p1075_p2 = por %p1074_p0, %p1073_p12 }
  0x37   : > { %p1069_p9 = pneg %p1068_p7 }
  0x39   : > { %p1076_p1 = pnand %p1075_p2, %p1069_p9 }
  0x3b   : > { %1079 = shalt.err (!%p1076_p1)
}
  0x3c   : > { %s1186_s29 = smov 128   ;;  %s1187_s30 = smov 8  }
  0x3d   : > { %931 = dma.hbm_to_vmem [thread:$0]  (!%p1261_p11), %s1511_s2, 384, %s1265_s25, [#allocation6], %s1186_s29, %s1186_s29, %s1187_s30  }
  0x3e   : > { %s1323_s6 = sadd.s32 1, %s1180_s15   ;;  %s27_s8 = sadd.s32 1, %s1176_s14 }
  0x3f   : > { %s24_s7 = ssub.s32 %s1180_s15, %s1323_s6  ;;  %p34_p6 = scmp.ne.s32.totalorder %s1176_s14, %s1172_s13 }
  0x40   : > { %p25_p13 = scmp.eq.s32.totalorder %s24_s7, 0  ;;  %p35_p10 = scmp.eq.s32.totalorder %s1180_s15, 0 }
  0x41   : > { %p1520_p5 = scmp.eq.s32.totalorder %s1231_s16, 1  ;;  %p942_p9 = scmp.lt.s32.totalorder %s1180_s15, 2 }
  0x42   : > { %s1332_s9 = scalar_select %p25_p13, %s1176_s14, %s27_s8  }
  0x43   : > { %p36_p3 = por %p35_p10, %p34_p6  ;;  %p1336_p7 = por %p1520_p5, %p34_p6 }
  0x44   : > { %s158_s10 = sand.u32 1, %s1176_s14   ;;  %s832_s25 = sshll.u32 %s1180_s15, 11 }
  0x45   : > { %s1521_s23 = scalar_select %p1336_p7, 1, 0 }
  0x46   : > { %s785_s11 = sshll.u32 %s158_s10, 7  ;;  %s1346_s24 = scalar_lea.hbm %s1509_s0, %s832_s25 }
  0x47   : > { %s162_s26 = scalar_lea.vmem [#allocation2], %s785_s11  ;;  %p1350_p11 = pnand %p942_p9, %p36_p3 }
  0x48   : > { %s170_s27 = sshll.u32 %s162_s26, 4  ;;  %s1354_s22 = scalar_lea.sflag [#allocation3], %s158_s10  ;;  %s1348_s27 = int_to_ptr.vmem [resolvable:$true] %s170_s27 }
  0x49   : > { %s1080_s4 = scalar_lea.hbm %s1346_s24, 2048  ;;  %p1082_p0 = pneg %p1350_p11 }
  0x4a   : > { %p1081_p12 = scmp.ne.s32.totalorder %s1346_s24, %s1080_s4  ;;  %s1085_s8 = scalar_lea.hbm %s1509_s0, 4096 }
  0x4b   : > { %p1086_p13 = scmp.lt.u32.totalorder %s1346_s24, %s1509_s0  ;;  %p1087_p6 = scmp.lt.u32.totalorder %s1085_s8, %s1080_s4 }
  0x4c   : > { %p1083_p2 = pnand %p1082_p0, %p1081_p12  ;;  %p1089_p3 = scmp.lt.u32.totalorder %s1080_s4, %s1346_s24 }
  0x4d   : > { %p1088_p10 = por %p1087_p6, %p1086_p13 }
  0x4e   : > { %p1084_p1 = pneg %p1083_p2 }
  0x4f   : > { %p1090_p5 = por %p1089_p3, %p1088_p10 }
  0x51   : > { %p1091_p9 = pnand %p1090_p5, %p1084_p1 }
  0x53   : > { %1094 = shalt.err (!%p1091_p9)
}
  0x54   : > { %s1095_s10 = scalar_lea.vmem %s1348_s27, 2048  ;;  %s1188_s17 = smov [#allocation2]  }
  0x55   : > { %p1096_p12 = scmp.ne.s32.totalorder %s1348_s27, %s1095_s10  ;;  %s1100_s21 = sshll.u32 %s1188_s17, 4  ;;  %s1101_s21 = int_to_ptr.vmem [resolvable:$false] %s1100_s21 }
  0x56   : > { %s1102_s26 = scalar_lea.vmem %s1101_s21, 4096  ;;  %p1103_p4 = scmp.lt.s32.totalorder %s1348_s27, %s1101_s21 }
  0x57   : > { %p1098_p2 = pnand %p1096_p12, %p1082_p0  ;;  %p1104_p13 = scmp.lt.s32.totalorder %s1102_s26, %s1095_s10 }
  0x59   : > { %p1099_p7 = pneg %p1098_p2  ;;  %p1105_p6 = por %p1104_p13, %p1103_p4 }
  0x5b   : > { %p1106_p10 = pnand %p1105_p6, %p1099_p7 }
  0x5d   : > { %1109 = shalt.err (!%p1106_p10)
}
  0x5e   : > { %935 = dma.hbm_to_vmem [thread:$0]  (!%p1350_p11), %s1346_s24, 2048, %s1348_s27, %s1354_s22, %s1186_s29, %s1186_s29, %s1187_s30  }
  0x5f   : > { %182 = sbr.rel (%p1250_p8) target bundleno = 419 (0x1a3), region = 32  ;;  %s1388_s4 = sand.u32 (!%p1250_p8), 1, %s1172_s13  }
  0x60   : > { %s790_s5 = sshll.u32 (!%p1250_p8), %s1388_s4, 7  ;;  %s185_s7 = scalar_lea.sflag (!%p1250_p8), [#allocation3], %s1388_s4 }
  0x61   : > { %s1392_s8 = scalar_lea.vmem (!%p1250_p8), [#allocation2], %s790_s5  ;;  %p1523_p4 = scmp.ne.s32.totalorder (!%p1250_p8), %s1516_s18, 0 }
  0x66   : > { %1155 = dma.done.wait (%p1523_p4), %s185_s7, 2048  }
  0x67   : > { %1157 = vsyncadd (%p1523_p4), %s185_s7, 4294965248  ;;  %p1524_p7 = scmp.eq.s32.totalorder %s1231_s16, 0 }
  0x69   : > { %1159 = dma.done.wait (%p1524_p7), [#allocation6], 2432   ;;  %p1525_p8 = pmov %p1524_p7 }
  0x6a   : > { %v984_v0 = vld [vmem:[#allocation5 + $0x40] sm:$0xff]   ;;  %v986_v2 = vld [vmem:[#allocation5 + $0x48] sm:$0xff]   ;;  %v988_v4 = vld [vmem:[#allocation5 + $0x50] sm:$0xff]   ;;  %vm661_vm0 = vcmask 1041409   ;;  %vm663_vm1 = vcmask 1042434   ;;  %s793_s18 = sshll.u32 %s1388_s4, 3 }
  0x6b   : > { %1161 = vsyncadd (%p1525_p8), [#allocation6], 4294964864  ;;  %v985_v1 = vld [vmem:[#allocation5] sm:$0xff]   ;;  %833 = vmatprep.subr.bf16.mxu0 %v984_v0  ;;  %897 = vmatprep.subr.bf16.mxu1 %v984_v0  ;;  %v987_v3 = vld [vmem:[#allocation5 + $0x8] sm:$0xff]   ;;  %vm665_vm2 = vcmask 1043459   ;;  %vm667_vm3 = vcmask 1044484  }
  0x6c   : > { %834 = vmatpush3.bf16.msra.mxu0 %v985_v1  ;;  %905 = vmatpush3.bf16.msra.mxu1 %v985_v1  ;;  %v989_v5 = vld [vmem:[#allocation5 + $0x10] sm:$0xff]   ;;  %v990_v6 = vld [vmem:[#allocation5 + $0x58] sm:$0xff]   ;;  %v992_v8 = vld [vmem:[#allocation5 + $0x60] sm:$0xff]   ;;  %vm669_vm4 = vcmask 1045509   ;;  %vm671_vm5 = vcmask 1046534   ;;  %s828_s20 = sshll.u32 %s1231_s16, 7 }
  0x6d   : > { %835 = vmatprep.subr.bf16.mxu0 %v986_v2  ;;  %898 = vmatprep.subr.bf16.mxu1 %v986_v2  ;;  %v991_v7 = vld [vmem:[#allocation5 + $0x18] sm:$0xff]   ;;  %v993_v9 = vld [vmem:[#allocation5 + $0x20] sm:$0xff]   ;;  %v994_v10 = vld [vmem:[#allocation5 + $0x68] sm:$0xff]   ;;  %s218_s29 = scalar_lea.vmem [#allocation8], %s793_s18  ;;  %vm673_vm6 = vcmask 1047559   ;;  %s1465_s28 = scalar_lea.hbm %s1512_s3, %s828_s20 }
  0x6e   : > { %v1002_v11 = vld [vmem:[%s1392_s8 + $0x4] ss:$8 sps:$4 sm:$0xff]   ;;  %v996_v14 = vld [vmem:[#allocation5 + $0x70] sm:$0xff]   ;;  %v998_v16 = vld [vmem:[#allocation5 + $0x78] sm:$0xff]   ;;  %s691_s30 = sshll.u32 %s218_s29, 4  ;;  %s678_s16 = scalar_lea.sflag [#allocation4], %s1388_s4  ;;  %s1467_s30 = int_to_ptr.vmem [resolvable:$true] %s691_s30 }
  0x6f   : > { %v1005_v12 = vld [vmem:[%s1392_s8 + $0x44] ss:$8 sps:$4 sm:$0xff]   ;;  %477 = vmatprep.mubr.bf16.mxu0 %v1002_v11  ;;  %v997_v15 = vld [vmem:[#allocation5 + $0x30] sm:$0xff]   ;;  %v999_v17 = vld [vmem:[#allocation5 + $0x38] sm:$0xff]   ;;  %s1110_s22 = scalar_lea.vmem %s1467_s30, 128  ;;  %p1526_p0 = scmp.ne.s32.totalorder %s1521_s23, 0 }
  0x70   : > { %836 = vmatpush3.bf16.msra.mxu0 %v987_v3  ;;  %906 = vmatpush3.bf16.msra.mxu1 %v987_v3  ;;  %v995_v13 = vld [vmem:[#allocation5 + $0x28] sm:$0xff]   ;;  %v1006_v20 = vld [vmem:[%s1392_s8 + $0x14] ss:$8 sps:$4 sm:$0xff]   ;;  %v1010_v22 = vld [vmem:[%s1392_s8 + $0x10] ss:$8 sps:$4 sm:$0xff]   ;;  %p1111_p11 = scmp.ne.s32.totalorder %s1467_s30, %s1110_s22  ;;  %s1189_s11 = smov [#allocation8]  }
  0x71   : > { %837 = vmatprep.subr.bf16.mxu0 %v988_v4  ;;  %899 = vmatprep.subr.bf16.mxu1 %v988_v4  ;;  %v1000_v18 = vld [vmem:[%s1392_s8] ss:$8 sps:$4 sm:$0xff]   ;;  %v1008_v21 = vld [vmem:[%s1392_s8 + $0x54] ss:$8 sps:$4 sm:$0xff]   ;;  %v1011_v23 = vld [vmem:[%s1392_s8 + $0x50] ss:$8 sps:$4 sm:$0xff]  }
  0x72   : > { %509 = vmatprep.mubr.bf16.mxu1 %v1005_v12  ;;  %v1003_v19 = vld [vmem:[%s1392_s8 + $0x40] ss:$8 sps:$4 sm:$0xff]   ;;  %v1012_v24 = vld [vmem:[%s1392_s8 + $0x24] ss:$8 sps:$4 sm:$0xff]   ;;  %v1018_v28 = vld [vmem:[%s1392_s8 + $0x34] ss:$8 sps:$4 sm:$0xff]   ;;  %p1112_p1 = pnand %p1111_p11, %p1526_p0 }
  0x73   : > { %v1014_v25 = vld [vmem:[%s1392_s8 + $0x64] ss:$8 sps:$4 sm:$0xff]   ;;  %v1016_v26 = vld [vmem:[%s1392_s8 + $0x20] ss:$8 sps:$4 sm:$0xff]   ;;  %v1020_v29 = vld [vmem:[%s1392_s8 + $0x74] ss:$8 sps:$4 sm:$0xff]  }
  0x74   : > { %838 = vmatpush3.bf16.msra.mxu0 %v989_v5  ;;  %907 = vmatpush3.bf16.msra.mxu1 %v989_v5  ;;  %v1017_v27 = vld [vmem:[%s1392_s8 + $0x60] ss:$8 sps:$4 sm:$0xff]   ;;  %v1022_v30 = vld [vmem:[%s1392_s8 + $0x30] ss:$8 sps:$4 sm:$0xff]   ;;  %p1113_p3 = pneg %p1112_p1  ;;  %s1114_s25 = sshll.u32 %s1189_s11, 4  ;;  %s1115_s25 = int_to_ptr.vmem [resolvable:$false] %s1114_s25 }
  0x75   : > { %839 = vmatprep.subr.bf16.mxu0 %v990_v6  ;;  %900 = vmatprep.subr.bf16.mxu1 %v990_v6  ;;  %v1023_v31 = vld [vmem:[%s1392_s8 + $0x70] ss:$8 sps:$4 sm:$0xff]   ;;  %v1420_v47 = vld [vmem:[#allocation7] sm:$0xff]  ;;  %v1424_v52 = vld [vmem:[#allocation7 + $0x8] sm:$0xff]  ;;  %s1116_s10 = scalar_lea.vmem %s1115_s25, 256  ;;  %p1117_p5 = scmp.lt.s32.totalorder %s1467_s30, %s1115_s25 }
  0x76   : > { %v1418_v40 = vld [vmem:[#allocation7 + $0x10] ss:$0 sm:$0xff]  ;;  %p1118_p9 = scmp.lt.s32.totalorder %s1116_s10, %s1110_s22 }
  0x78   : > { %840 = vmatpush3.bf16.msra.mxu0 %v991_v7  ;;  %908 = vmatpush3.bf16.msra.mxu1 %v991_v7  ;;  %p1119_p12 = por %p1118_p9, %p1117_p5 }
  0x79   : > { %841 = vmatprep.subr.bf16.mxu0 %v992_v8  ;;  %901 = vmatprep.subr.bf16.mxu1 %v992_v8 }
  0x7a   : > { %p1120_p2 = pnand %p1119_p12, %p1113_p3 }
  0x7c   : > { %842 = vmatpush3.bf16.msra.mxu0 %v993_v9  ;;  %909 = vmatpush3.bf16.msra.mxu1 %v993_v9 }
  0x7d   : > { %843 = vmatprep.subr.bf16.mxu0 %v994_v10  ;;  %902 = vmatprep.subr.bf16.mxu1 %v994_v10 }
  0x80   : > { %844 = vmatpush3.bf16.msra.mxu0 %v995_v13  ;;  %910 = vmatpush3.bf16.msra.mxu1 %v995_v13 }
  0x81   : > { %845 = vmatprep.subr.bf16.mxu0 %v996_v14  ;;  %903 = vmatprep.subr.bf16.mxu1 %v996_v14 }
  0x84   : > { %846 = vmatpush3.bf16.msra.mxu0 %v997_v15  ;;  %911 = vmatpush3.bf16.msra.mxu1 %v997_v15 }
  0x85   : > { %847 = vmatprep.subr.bf16.mxu0 %v998_v16  ;;  %904 = vmatprep.subr.bf16.mxu1 %v998_v16 }
  0x88   : > { %848 = vmatpush3.bf16.msra.mxu0 %v999_v17  ;;  %912 = vmatpush3.bf16.msra.mxu1 %v999_v17 }
  0x8b   : > { %478 = vmatmul.mubr.bf16.vlgmr.msra.gmra.mrb[0].mxu0 %v1000_v18  ;;  %510 = vmatmul.mubr.bf16.vlgmr.msra.gmra.mrb[0].mxu1 %v1003_v19 }
  0x8c   : > { %485 = vmatprep.mubr.bf16.mxu0 %v1006_v20  ;;  %517 = vmatprep.mubr.bf16.mxu1 %v1008_v21 }
  0x93   : > { %486 = vmatmul.mubr.bf16.gmra.mrb[4].mxu0 %v1010_v22  ;;  %518 = vmatmul.mubr.bf16.gmra.mrb[4].mxu1 %v1011_v23 }
  0x94   : > { %493 = vmatprep.mubr.bf16.mxu0 %v1012_v24  ;;  %525 = vmatprep.mubr.bf16.mxu1 %v1014_v25 }
  0x9b   : > { %494 = vmatmul.mubr.bf16.gmra.mrb[8].mxu0 %v1016_v26  ;;  %526 = vmatmul.mubr.bf16.gmra.mrb[8].mxu1 %v1017_v27 }
  0x9c   : > { %501 = vmatprep.mubr.bf16.mxu0 %v1018_v28  ;;  %533 = vmatprep.mubr.bf16.mxu1 %v1020_v29 }
  0xa3   : > { %502 = vmatmul.mubr.bf16.gmra.mrb[12].mxu0 %v1022_v30  ;;  %534 = vmatmul.mubr.bf16.gmra.mrb[12].mxu1 %v1023_v31 }
 0x15e   : > { %v849_v32 = vpop.f32.mrb[0].mxu0  ;;  %v873_v33 = vpop.f32.mrb[0].mxu1 }
 0x15f   : > { %v850_v34 = vpop.f32.mrb[1].mxu0  ;;  %v874_v35 = vpop.f32.mrb[1].mxu1 }
 0x160   : > { %v851_v36 = vadd.f32 %v850_v34, %v849_v32  ;;  %v875_v37 = vadd.f32 %v874_v35, %v873_v33  ;;  %v852_v38 = vpop.f32.mrb[2].mxu0  ;;  %v876_v39 = vpop.f32.mrb[2].mxu1 }
 0x161   : > { %v853_v41 = vpop.f32.mrb[3].mxu0  ;;  %v877_v42 = vpop.f32.mrb[3].mxu1 }
 0x162   : > { %v542_v43 = vmax.f32 %v851_v36, 0.0  ;;  %v550_v44 = vmax.f32 %v875_v37, 0.0  ;;  %v854_v45 = vadd.f32 %v853_v41, %v852_v38  ;;  %v878_v46 = vadd.f32 %v877_v42, %v876_v39 }
 0x164   : > { %v565_v48 = vmul.f32 %v1418_v40, %v542_v43  ;;  %v573_v49 = vmul.f32 %v1418_v40, %v550_v44  ;;  %v543_v50 = vmax.f32 %v854_v45, 0.0  ;;  %v551_v51 = vmax.f32 %v878_v46, 0.0 }
 0x166   : > { %v589_v53 = vadd.f32 %v573_v49, %v1420_v47  ;;  %v566_v54 = vmul.f32 %v1418_v40, %v543_v50  ;;  %v574_v55 = vmul.f32 %v1418_v40, %v551_v51  ;;  %v855_v56 = vpop.f32.mrb[4].mxu0  ;;  %v879_v57 = vpop.f32.mrb[4].mxu1  ;;  %v581_v58 = vadd.f32 %v565_v48, %v1420_v47 }
 0x167   : > { %v856_v59 = vpop.f32.mrb[5].mxu0  ;;  %v880_v60 = vpop.f32.mrb[5].mxu1 }
 0x168   : > { %v582_v61 = vadd.f32 %v566_v54, %v1424_v52  ;;  %v590_v62 = vadd.f32 %v574_v55, %v1424_v52  ;;  %v857_v63 = vadd.f32 %v856_v59, %v855_v56  ;;  %v881_v0 = vadd.f32 %v880_v60, %v879_v57  ;;  %v858_v1 = vpop.f32.mrb[6].mxu0  ;;  %v882_v2 = vpop.f32.mrb[6].mxu1 }
 0x169   : > { %v859_v3 = vpop.f32.mrb[7].mxu0  ;;  %v883_v4 = vpop.f32.mrb[7].mxu1 }
 0x16a   : > { %v597_v5 = vmax.f32 %v581_v58, %v582_v61  ;;  %v1432_v6 = vmax.f32 %v589_v53, %v590_v62  ;;  %v544_v7 = vmax.f32 %v857_v63, 0.0  ;;  %v552_v8 = vmax.f32 %v881_v0, 0.0 }
 0x16b   : > { %v860_v9 = vadd.f32 %v859_v3, %v858_v1  ;;  %v884_v10 = vadd.f32 %v883_v4, %v882_v2 }
 0x16c   : > { %v598_v11 = vrot.slane %v597_v5, 4  ;;  %v575_v12 = vmul.f32 %v1418_v40, %v552_v8  ;;  %v567_v13 = vmul.f32 %v1418_v40, %v544_v7  ;;  %v626_v58 = vrot.slane %v1432_v6, 4 }
 0x16d   : > { %v545_v14 = vmax.f32 %v860_v9, 0.0  ;;  %v553_v15 = vmax.f32 %v884_v10, 0.0 }
 0x16e   : > { %v599_v16 = vmax.f32 %v597_v5, %v598_v11  ;;  %v861_v17 = vpop.f32.mrb[8].mxu0  ;;  %v885_v18 = vpop.f32.mrb[8].mxu1  ;;  %v591_v19 = vadd.f32 %v575_v12, %v1420_v47  ;;  %v583_v29 = vadd.f32 %v567_v13, %v1420_v47 }
 0x16f   : > { %v568_v20 = vmul.f32 %v1418_v40, %v545_v14  ;;  %v576_v21 = vmul.f32 %v1418_v40, %v553_v15  ;;  %v862_v22 = vpop.f32.mrb[9].mxu0  ;;  %v886_v23 = vpop.f32.mrb[9].mxu1 }
 0x170   : > { %v600_v24 = vrot.slane %v599_v16, 2  ;;  %v863_v25 = vadd.f32 %v862_v22, %v861_v17  ;;  %v887_v26 = vadd.f32 %v886_v23, %v885_v18  ;;  %v864_v27 = vpop.f32.mrb[10].mxu0  ;;  %v888_v28 = vpop.f32.mrb[10].mxu1 }
 0x171   : > { %v584_v30 = vadd.f32 %v568_v20, %v1424_v52  ;;  %v592_v31 = vadd.f32 %v576_v21, %v1424_v52  ;;  %v865_v32 = vpop.f32.mrb[11].mxu0  ;;  %v889_v33 = vpop.f32.mrb[11].mxu1 }
 0x172   : > { %v546_v34 = vmax.f32 %v863_v25, 0.0  ;;  %v554_v35 = vmax.f32 %v887_v26, 0.0  ;;  %v866_v38 = vadd.f32 %v865_v32, %v864_v27  ;;  %v890_v39 = vadd.f32 %v889_v33, %v888_v28 }
 0x173   : > { %v604_v36 = vmax.f32 %v583_v29, %v584_v30  ;;  %v632_v37 = vmax.f32 %v591_v19, %v592_v31  ;;  %v601_v41 = vmax.f32 %v599_v16, %v600_v24  ;;  %v627_v25 = vmax.f32 %v1432_v6, %v626_v58 }
 0x174   : > { %v577_v42 = vmul.f32 %v1418_v40, %v554_v35  ;;  %v569_v44 = vmul.f32 %v1418_v40, %v546_v34  ;;  %v547_v45 = vmax.f32 %v866_v38, 0.0  ;;  %v555_v46 = vmax.f32 %v890_v39, 0.0 }
 0x175   : > { %v605_v43 = vrot.slane %v604_v36, 4  ;;  %v602_v57 = vrot.slane %v601_v41, 1  ;;  %v633_v11 = vrot.slane %v632_v37, 4  ;;  %v628_v38 = vrot.slane %v627_v25, 2 }
 0x176   : > { %v867_v48 = vpop.f32.mrb[12].mxu0  ;;  %v891_v49 = vpop.f32.mrb[12].mxu1  ;;  %v593_v51 = vadd.f32 %v577_v42, %v1420_v47  ;;  %v570_v53 = vmul.f32 %v1418_v40, %v547_v45  ;;  %v578_v54 = vmul.f32 %v1418_v40, %v555_v46  ;;  %v585_v0 = vadd.f32 %v569_v44, %v1420_v47 }
 0x177   : > { %v606_v50 = vmax.f32 %v604_v36, %v605_v43  ;;  %v868_v55 = vpop.f32.mrb[13].mxu0  ;;  %v892_v56 = vpop.f32.mrb[13].mxu1  ;;  %v603_v24 = vmax.f32 %v601_v41, %v602_v57  ;;  %v634_v28 = vmax.f32 %v632_v37, %v633_v11  ;;  %v629_v44 = vmax.f32 %v627_v25, %v628_v38 }
 0x178   : > { %v869_v59 = vadd.f32 %v868_v55, %v867_v48  ;;  %v893_v60 = vadd.f32 %v892_v56, %v891_v49  ;;  %v870_v61 = vpop.f32.mrb[14].mxu0  ;;  %v894_v62 = vpop.f32.mrb[14].mxu1  ;;  %v586_v1 = vadd.f32 %v570_v53, %v1424_v52  ;;  %v594_v2 = vadd.f32 %v578_v54, %v1424_v52 }
 0x179   : > { %v607_v63 = vrot.slane %v606_v50, 2  ;;  %v871_v3 = vpop.f32.mrb[15].mxu0  ;;  %v895_v4 = vpop.f32.mrb[15].mxu1  ;;  %v630_v54 = vrot.slane %v629_v44, 1 }
 0x17a   : > { %v548_v5 = vmax.f32 %v869_v59, 0.0  ;;  %v556_v7 = vmax.f32 %v893_v60, 0.0  ;;  %v872_v8 = vadd.f32 %v871_v3, %v870_v61  ;;  %v896_v9 = vadd.f32 %v895_v4, %v894_v62 }
 0x17b   : > { %v608_v10 = vmax.f32 %v606_v50, %v607_v63  ;;  %v611_v12 = vmax.f32 %v585_v0, %v586_v1  ;;  %v639_v13 = vmax.f32 %v593_v51, %v594_v2  ;;  %v631_v60 = vmax.f32 %v629_v44, %v630_v54 }
 0x17c   : > { %v571_v14 = vmul.f32 %v1418_v40, %v548_v5  ;;  %v579_v15 = vmul.f32 %v1418_v40, %v556_v7  ;;  %v549_v16 = vmax.f32 %v872_v8, 0.0  ;;  %v557_v17 = vmax.f32 %v896_v9, 0.0 }
 0x17d   : > { %v609_v18 = vrot.slane %v608_v10, 1  ;;  %v612_v19 = vrot.slane %v611_v12, 4  ;;  %v640_v20 = vrot.slane %v639_v13, 4 }
 0x17e   : > { %v595_v21 = vadd.f32 %v579_v15, %v1420_v47  ;;  %v572_v22 = vmul.f32 %v1418_v40, %v549_v16  ;;  %v580_v23 = vmul.f32 %v1418_v40, %v557_v17  ;;  %v587_v29 = vadd.f32 %v571_v14, %v1420_v47 }
 0x17f   : > { %v610_v26 = vmax.f32 %v608_v10, %v609_v18  ;;  %v613_v27 = vmax.f32 %v611_v12, %v612_v19  ;;  %v641_v34 = vmax.f32 %v639_v13, %v640_v20  ;;  %v635_v40 = vrot.slane %v634_v28, 2 }
 0x180   : > { %v588_v30 = vadd.f32 %v572_v22, %v1424_v52  ;;  %v596_v31 = vadd.f32 %v580_v23, %v1424_v52 }
 0x181   : > { %v662_v32 = vsel %vm661_vm0, %v610_v26, %v603_v24  ;;  %v614_v33 = vrot.slane %v613_v27, 2  ;;  %v642_v43 = vrot.slane %v641_v34, 2  ;;  %v636_v46 = vmax.f32 %v634_v28, %v635_v40 }
 0x182   : > { %v618_v35 = vmax.f32 %v587_v29, %v588_v30  ;;  %v646_v36 = vmax.f32 %v595_v21, %v596_v31 }
 0x183   : > { %v615_v39 = vmax.f32 %v613_v27, %v614_v33  ;;  %v643_v50 = vmax.f32 %v641_v34, %v642_v43  ;;  %v637_v55 = vrot.slane %v636_v46, 1 }
 0x184   : > { %v619_v41 = vrot.slane %v618_v35, 4  ;;  %v647_v6 = vrot.slane %v646_v36, 4 }
 0x185   : > { %v616_v42 = vrot.slane %v615_v39, 1  ;;  %v644_v57 = vrot.slane %v643_v50, 1  ;;  %v638_v61 = vmax.f32 %v636_v46, %v637_v55 }
 0x186   : > { %v620_v37 = vmax.f32 %v618_v35, %v619_v41  ;;  %v648_v47 = vmax.f32 %v646_v36, %v647_v6 }
 0x187   : > { %v617_v45 = vmax.f32 %v615_v39, %v616_v42  ;;  %v645_v63 = vmax.f32 %v643_v50, %v644_v57 }
 0x188   : > { %v621_v52 = vrot.slane %v620_v37, 2  ;;  %v649_v48 = vrot.slane %v648_v47, 2 }
 0x189   : > { %v664_v49 = vsel %vm663_vm1, %v617_v45, %v662_v32 }
 0x18a   : > { %v622_v51 = vmax.f32 %v620_v37, %v621_v52  ;;  %v650_v53 = vmax.f32 %v648_v47, %v649_v48 }
 0x18c   : > { %v623_v56 = vrot.slane %v622_v51, 1  ;;  %v651_v59 = vrot.slane %v650_v53, 1 }
 0x18e   : > { %v624_v58 = vmax.f32 %v622_v51, %v623_v56  ;;  %v652_v1 = vmax.f32 %v650_v53, %v651_v59 }
 0x190   : > { %v666_v62 = vsel %vm665_vm2, %v624_v58, %v664_v49 }
 0x191   : > { %v668_v0 = vsel %vm667_vm3, %v631_v60, %v666_v62 }
 0x192   : > { %v670_v2 = vsel %vm669_vm4, %v638_v61, %v668_v0 }
 0x193   : > { %v672_v3 = vsel %vm671_vm5, %v645_v63, %v670_v2 }
 0x194   : > { %v674_v4 = vsel %vm673_vm6, %v652_v1, %v672_v3 }
 0x195   : > { %676 = vst [vmem:[%s218_s29] sm:$0xff] %v674_v4 }
 0x196   : > { %1123 = shalt.err (!%p1120_p2)
}
 0x197   : > { %s1124_s17 = scalar_lea.hbm %s1465_s28, 128  ;;  %s1128_s4 = scalar_lea.hbm %s1512_s3, 256 }
 0x198   : > { %p1125_p13 = scmp.ne.s32.totalorder %s1465_s28, %s1124_s17  ;;  %p1129_p4 = scmp.lt.u32.totalorder %s1465_s28, %s1512_s3 }
 0x199   : > { %p1130_p7 = scmp.lt.u32.totalorder %s1128_s4, %s1124_s17  ;;  %p1132_p11 = scmp.lt.u32.totalorder %s1124_s17, %s1465_s28 }
 0x19a   : > { %p1126_p6 = pnand %p1125_p13, %p1526_p0 }
 0x19b   : > { %p1131_p8 = por %p1130_p7, %p1129_p4 }
 0x19c   : > { %p1127_p10 = pneg %p1126_p6 }
 0x19d   : > { %p1133_p1 = por %p1132_p11, %p1131_p8 }
 0x19f   : > { %p1134_p3 = pnand %p1133_p1, %p1127_p10 }
 0x1a1   : > { %1137 = shalt.err (!%p1134_p3)
}
 0x1a2   : > { %923 = dma.vmem_to_hbm [thread:$0]  (%p1526_p0), %s1467_s30, 128, %s1465_s28, %s678_s16  }
 0x1a3 PF: > { %s703_s8 = sand.u32 1, %s1168_s12   ;;  %p1527_p5 = scmp.ne.s32.totalorder %s1517_s19, 0 }
 0x1a4   : > { %p1528_p9 = scmp.ge.s32.totalorder %s1180_s15, 2  ;;  %s704_s18 = scalar_lea.sflag [#allocation4], %s703_s8 }
 0x1a6   : > { %p937_p12 = pnand %p1528_p9, %p1527_p5 }
 0x1a8   : > { %1163 = dma.done.wait (!%p937_p12), %s704_s18, 128  }
 0x1a9   : > { %1165 = vsyncadd (!%p937_p12), %s704_s18, 4294967168  ;;  %p17_p2 = scmp.ge.s32.totalorder %s1323_s6, 4   ;;  %s1529_s12 = smov %s1172_s13 }
 0x1aa   : > { %s1530_s13 = smov %s1176_s14  ;;  %s1531_s14 = smov %s1332_s9 }
 0x1ab   : > { %s1532_s15 = smov %s1323_s6  ;;  %19 = sbr.rel (!%p17_p2) target bundleno = 6 (0x6), region = 85 }
 0x1b2   :  { %709 = vsyncpa [#allocation3], 1 }
 0x1b3   :  { %711 = vsyncpa [#allocation3 + $0x1], 1 }
 0x1b4   :  { %712 = vsyncpa [#allocation6], 1 }
 0x1b5   :  { %713 = vsyncpa [#allocation4], 1 }
 0x1b6   :  { %715 = vsyncpa [#allocation4 + $0x1], 1 }

</bundles_post_ra>
